<compile_context>
chip_gen: v6e
topology: v6e:2x2x1
jax: 0.10.0
libtpu: 0.0.40
codegen_flags: <defaults>
</compile_context>

<pallas_src>
import jax
import jax.numpy as jnp
import numpy as np
from jax.experimental import pallas as pl
from jax.experimental.pallas import tpu as pltpu


def feature_emb_attention_kernel(x_ref, q_ref, z_ref, attn_ref):
    # x_ref:    (TB, S, D)  input features (f32 or bf16)
    # q_ref:    (1, D)      query vector
    # z_ref:    (TB, D)     weighted feature sum (x dtype)
    # attn_ref: (TB, S)     softmax attention weights (f32)
    TB, S, D = x_ref.shape
    x = x_ref[...].astype(jnp.float32)                       # (TB, S, D)

    # Fold both 1/d**0.25 scales into a single multiply on the tiny query.
    inv_sqrt_d = 1.0 / (float(D) ** 0.5)
    q = (q_ref[...].astype(jnp.float32) * inv_sqrt_d).reshape(1, 1, D)

    # Scores: one streaming pass over x (VPU multiply + XLU lane reduce),
    # hidden under the HBM->VMEM DMA of the next tile.
    scores = jnp.sum(x * q, axis=-1)                         # (TB, S) f32

    # TODO(synk): optional `mask` argument (masked_fill with -1e6 + re-mask)
    # from the PyTorch module is not implemented (mask=None path only).

    # Numerically stable softmax over seqlen (exact divide -- it's free here).
    m = jnp.max(scores, axis=-1, keepdims=True)
    e = jnp.exp(scores - m)
    denom = jnp.sum(e, axis=-1, keepdims=True)
    p = e / denom                                            # (TB, S) f32
    attn_ref[...] = p

    # z: weighted sum over seqlen with f32 accumulation (VPU + sublane reduce).
    z = jnp.sum(p[:, :, None] * x, axis=1)                   # (TB, D) f32
    z_ref[...] = z.astype(z_ref.dtype)


def _pick_batch_tile(B, S, D, itemsize):
    """Largest legal batch tile whose padded, double-buffered VMEM footprint
    (x blocks + in-kernel f32 temporaries + z/attn blocks) fits a 14 MiB
    budget (under v5e's 16 MiB scoped default; trivially under v6e/v7x).
    Prefers >= 4 grid steps so pipelining / megacore sharding engage."""
    budget = 14 * 1024 * 1024
    min_x_tile = 512 * 1024

    def rup(a, m):
        return ((a + m - 1) // m) * m

    sub = 8 * max(1, 4 // max(1, itemsize))        # sublane multiple (packed dtypes)

    def x_tile_bytes(tb):
        return tb * rup(S, sub) * rup(D, 128) * itemsize

    def footprint(tb):
        x_blk = x_tile_bytes(tb)                                   # double-buffered
        x_tmp = tb * rup(S, 8) * rup(D, 128) * 4                   # f32 temporaries
        z_blk = rup(tb, sub) * rup(D, 128) * itemsize
        a_blk = rup(tb, 8) * rup(S, 128) * 4
        return 2 * x_blk + 2 * x_tmp + 2 * (z_blk + a_blk)

    # Candidate tiles: divisors of B that keep (tb, D)/(tb, S) output blocks
    # legal under the (8, 128) rule: tb == B or tb % 8 == 0.
    cands = [d for d in range(1, B + 1) if B % d == 0 and (d == B or d % 8 == 0)]
    fits = [d for d in cands if footprint(d) <= budget]
    if not fits:
        return min(cands)
    tb = max(fits)
    for d in sorted(fits, reverse=True):
        if B // d >= 4 and x_tile_bytes(d) >= min_x_tile:
            tb = d
            break
    return tb


def feature_emb_attention(x, queryv, *, batch_tile=None):
    """x: (B, S, D), queryv: (D,) -> (z: (B, D) x.dtype, attn: (B, S) f32)."""
    B, S, D = x.shape
    tb = batch_tile if batch_tile is not None else _pick_batch_tile(
        B, S, D, x.dtype.itemsize)
    assert B % tb == 0, "batch tile must divide the batch"
    assert tb == B or tb % 8 == 0, "batch tile must be B or a multiple of 8"
    q2 = queryv.reshape(1, D)

    z, attn = pl.pallas_call(
        feature_emb_attention_kernel,
        out_shape=(
            jax.ShapeDtypeStruct((B, D), x.dtype),
            jax.ShapeDtypeStruct((B, S), jnp.float32),
        ),
        grid=(B // tb,),
        in_specs=[
            pl.BlockSpec((tb, S, D), lambda b: (b, 0, 0)),
            pl.BlockSpec((1, D), lambda b: (0, 0)),
        ],
        out_specs=(
            pl.BlockSpec((tb, D), lambda b: (b, 0)),
            pl.BlockSpec((tb, S), lambda b: (b, 0)),
        ),
        compiler_params=pltpu.CompilerParams(
            dimension_semantics=("parallel",)),   # megacore sharding on v7x
    )(x, q2)
    return z, attn


def feature_emb_attention_ref(x, queryv):
    d = x.shape[-1]
    scale = 1.0 / (float(d) ** 0.25)
    scores = jnp.einsum("bsd,d->bs", x.astype(jnp.float32) * scale,
                        queryv.astype(jnp.float32) * scale)
    p = jax.nn.softmax(scores, axis=1)
    z = jnp.einsum("bs,bsd->bd", p, x.astype(jnp.float32))
    return z.astype(x.dtype), p


def _check(z, attn, z_r, attn_r, rtol, atol):
    np.testing.assert_allclose(np.asarray(z.astype(jnp.float32)),
                               np.asarray(z_r.astype(jnp.float32)),
                               rtol=rtol, atol=atol)
    np.testing.assert_allclose(np.asarray(attn), np.asarray(attn_r),
                               rtol=rtol, atol=atol)


if __name__ == "__main__":
    key = jax.random.PRNGKey(0)
    kx, kq, kx2, kq2, kx3, kq3 = jax.random.split(key, 6)

    # 1) Small shapes implied by the module: bsize=2, seqlen=8, input_dim=32.
    B, S, D = 2, 8, 32
    x = jax.random.normal(kx, (B, S, D), dtype=jnp.float32)
    queryv = jax.random.normal(kq, (D,), dtype=jnp.float32)  # nn.Parameter(randn)
    z, attn = feature_emb_attention(x, queryv)
    jax.block_until_ready((z, attn))
    z_r, attn_r = feature_emb_attention_ref(x, queryv)
    _check(z, attn, z_r, attn_r, rtol=1e-4, atol=1e-5)

    # 2) Multi-step batch grid (grid=(2,)) with a legal tile (tb % 8 == 0).
    B2, S2, D2 = 16, 16, 128
    x2 = jax.random.normal(kx2, (B2, S2, D2), dtype=jnp.float32)
    queryv2 = jax.random.normal(kq2, (D2,), dtype=jnp.float32)
    z2, attn2 = feature_emb_attention(x2, queryv2, batch_tile=8)
    jax.block_until_ready((z2, attn2))
    z2_r, attn2_r = feature_emb_attention_ref(x2, queryv2)
    _check(z2, attn2, z2_r, attn2_r, rtol=1e-4, atol=1e-5)

    # 3) bf16 streaming path (f32 softmax + f32 accumulation inside).
    B3, S3, D3 = 8, 16, 128
    x3 = jax.random.normal(kx3, (B3, S3, D3), dtype=jnp.float32).astype(jnp.bfloat16)
    queryv3 = jax.random.normal(kq3, (D3,), dtype=jnp.float32)
    z3, attn3 = feature_emb_attention(x3, queryv3)
    jax.block_until_ready((z3, attn3))
    z3_r, attn3_r = feature_emb_attention_ref(x3, queryv3)
    _check(z3, attn3, z3_r, attn3_r, rtol=2e-2, atol=2e-2)

    print("KERNEL_OK")
</pallas_src>

<mosaic_0001>
module attributes {stable_mosaic.version = 11 : i64} {
  func.func @feature_emb_attention_kernel(%arg0: i32, %arg1: memref<2x8x32xf32, #tpu.memory_space<vmem>>, %arg2: memref<1x32xf32, #tpu.memory_space<vmem>>, %arg3: memref<2x32xf32, #tpu.memory_space<vmem>>, %arg4: memref<2x8xf32, #tpu.memory_space<vmem>>) attributes {dimension_semantics = [#tpu.dimension_semantics<parallel>], iteration_bounds = array<i64: 1>, scalar_prefetch = 0 : i64, scratch_operands = 0 : i64, tpu.core_type = #tpu.core_type<tc>, window_params = [{transform_indices = @transform_0, window_bounds = array<i64: 2, 8, 32>}, {pipeline_mode = #tpu.pipeline_mode<synchronous>, transform_indices = @transform_1, window_bounds = array<i64: 1, 32>}, {transform_indices = @transform_2, window_bounds = array<i64: 2, 32>}, {transform_indices = @transform_3, window_bounds = array<i64: 2, 8>}]} {
    %c0 = arith.constant 0 : index
    %c0_0 = arith.constant 0 : index
    %c0_1 = arith.constant 0 : index
    %0 = vector.load %arg1[%c0, %c0_0, %c0_1] : memref<2x8x32xf32, #tpu.memory_space<vmem>>, vector<2x8x32xf32>
    %c0_2 = arith.constant 0 : index
    %c0_3 = arith.constant 0 : index
    %1 = vector.load %arg2[%c0_2, %c0_3] : memref<1x32xf32, #tpu.memory_space<vmem>>, vector<1x32xf32>
    %cst = arith.constant 0.176776692 : f32
    %2 = vector.broadcast %cst : f32 to vector<1x32xf32>
    %3 = arith.mulf %1, %2 : vector<1x32xf32>
    %4 = vector.shape_cast %3 : vector<1x32xf32> to vector<1x1x32xf32>
    %5 = vector.broadcast %4 : vector<1x1x32xf32> to vector<2x8x32xf32>
    %6 = arith.mulf %0, %5 : vector<2x8x32xf32>
    %cst_4 = arith.constant dense<0.000000e+00> : vector<2x8xf32>
    %7 = vector.multi_reduction <add>, %6, %cst_4 [2] : vector<2x8x32xf32> to vector<2x8xf32>
    %cst_5 = arith.constant dense<0xFF800000> : vector<2xf32>
    %8 = vector.multi_reduction <maximumf>, %7, %cst_5 [1] : vector<2x8xf32> to vector<2xf32>
    %9 = vector.shape_cast %8 : vector<2xf32> to vector<2x1xf32>
    %10 = vector.broadcast %9 : vector<2x1xf32> to vector<2x8xf32>
    %11 = arith.subf %7, %10 : vector<2x8xf32>
    %12 = math.exp %11 : vector<2x8xf32>
    %cst_6 = arith.constant dense<0.000000e+00> : vector<2xf32>
    %13 = vector.multi_reduction <add>, %12, %cst_6 [1] : vector<2x8xf32> to vector<2xf32>
    %14 = vector.shape_cast %13 : vector<2xf32> to vector<2x1xf32>
    %15 = vector.broadcast %14 : vector<2x1xf32> to vector<2x8xf32>
    %16 = arith.divf %12, %15 : vector<2x8xf32>
    %c0_7 = arith.constant 0 : index
    %c0_8 = arith.constant 0 : index
    %17 = vector.load %arg4[%c0_7, %c0_8] : memref<2x8xf32, #tpu.memory_space<vmem>>, vector<2x8xf32>
    tpu.vector_store %arg4[%c0_7, %c0_8], %16 {strides = array<i32>} : memref<2x8xf32, #tpu.memory_space<vmem>>, vector<2x8xf32>,
    %18 = vector.shape_cast %16 : vector<2x8xf32> to vector<2x8x1xf32>
    %19 = vector.broadcast %18 : vector<2x8x1xf32> to vector<2x8x32xf32>
    %20 = arith.mulf %19, %0 : vector<2x8x32xf32>
    %cst_9 = arith.constant dense<0.000000e+00> : vector<2x32xf32>
    %21 = vector.multi_reduction <add>, %20, %cst_9 [1] : vector<2x8x32xf32> to vector<2x32xf32>
    %c0_10 = arith.constant 0 : index
    %c0_11 = arith.constant 0 : index
    %22 = vector.load %arg3[%c0_10, %c0_11] : memref<2x32xf32, #tpu.memory_space<vmem>>, vector<2x32xf32>
    tpu.vector_store %arg3[%c0_10, %c0_11], %21 {strides = array<i32>} : memref<2x32xf32, #tpu.memory_space<vmem>>, vector<2x32xf32>,
    return
  }
  func.func @transform_0(%arg0: i32) -> (i32, i32, i32) {
    %c0_i32 = arith.constant 0 : i32
    %c0_i32_0 = arith.constant 0 : i32
    %c0_i32_1 = arith.constant 0 : i32
    return %arg0, %c0_i32, %c0_i32_0 : i32, i32, i32
  }
  func.func @transform_1(%arg0: i32) -> (i32, i32) {
    %c0_i32 = arith.constant 0 : i32
    %c0_i32_0 = arith.constant 0 : i32
    %c0_i32_1 = arith.constant 0 : i32
    return %c0_i32, %c0_i32_0 : i32, i32
  }
  func.func @transform_2(%arg0: i32) -> (i32, i32) {
    %c0_i32 = arith.constant 0 : i32
    %c0_i32_0 = arith.constant 0 : i32
    return %arg0, %c0_i32 : i32, i32
  }
  func.func @transform_3(%arg0: i32) -> (i32, i32) {
    %c0_i32 = arith.constant 0 : i32
    %c0_i32_0 = arith.constant 0 : i32
    return %arg0, %c0_i32 : i32, i32
  }
}

</mosaic_0001>

<bundles_post_ra>
// kernel: tpu_custom_call.1
= control target key start
LH: loop header
LB: loop body
LE: loop exit
PB: predicated region body
PF: predicated region fallthrough
CT: control target
= control target key end

     0   :  { %9 = vsyncpa [#allocation3], 0  ;;  %s331_s0 = inlined_call_operand.hbm [shape: f32[2,8,32], index: 0, kind: input, shape index: {}]   ;;  %s332_s1 = inlined_call_operand.vmem [shape: f32[1,32], index: 1, kind: input, shape index: {}]   ;;  %s333_s2 = inlined_call_operand.hbm [shape: f32[2,32], index: 2, kind: output, shape index: {0}]   ;;  %s334_s3 = inlined_call_operand.hbm [shape: f32[2,8], index: 3, kind: output, shape index: {1}]  }
   0x1   :  { %10 = vsyncpa [#allocation4], 0 }
   0x2   :  { %11 = vsyncpa [#allocation7], 0  ;;  %s274_s12 = smov [#allocation2]  }
   0x3   :  { %s17_s13 = sshll.u32 %s274_s12, 4  ;;  %s18_s13 = int_to_ptr.vmem [resolvable:$true] %s17_s13 }
   0x4   :  { %s216_s14 = scalar_lea.vmem %s18_s13, 256  ;;  %p221_p1 = scmp.lt.s32.totalorder %s18_s13, %s18_s13 }
   0x5   :  { %p217_p0 = scmp.ne.s32.totalorder %s18_s13, %s216_s14  ;;  %p222_p2 = scmp.lt.s32.totalorder %s216_s14, %s216_s14 }
   0x7   :  { %p223_p3 = por %p222_p2, %p221_p1 }
   0x9   :  { %p224_p4 = pnand %p223_p3, %p217_p0 }
   0xb   :  { %227 = shalt.err (!%p224_p4)
}
   0xc   :  { %s275_s15 = smov 128   ;;  %s276_s16 = smov 8  }
   0xd   :  { %23 = dma.hbm_to_vmem [thread:$0]  %s331_s0, 256, %s18_s13, [#allocation3], %s275_s15, %s275_s15, %s276_s16  }
   0xe   :  { %268 = dma.done.wait [#allocation3], 256  }
   0xf   :  { %269 = vsyncadd [#allocation3], 4294967040  ;;  %v34_v0 = vlaneseq  ;;  %v31_v5 = vld [vmem:[%s332_s1] sm:$0x1]  ;;  %v30_v8 = vld [vmem:[#allocation2 + $0x8] sm:$0xff]  ;;  %vm41_vm0 = vcmask 261120  }
  0x10   :  { %v32_v6 = vmul.f32 0.17677669, %v31_v5  ;;  %v29_v7 = vld [vmem:[#allocation2] sm:$0xff]  ;;  %vm60_vm1 = vcmask 1041409   ;;  %vm63_vm2 = vcmask 58368   ;;  %v277_v20 = vmov 0  }
  0x11   :  { %v35_v1 = vshrl.u32 %v34_v0, 7  ;;  %v51_v2 = vand.u32 127, %v34_v0  ;;  %199 = vset.pattern.permute.xlu0 %v277_v20  ;;  %198 = vset.pattern.permute.xlu1 %v277_v20  ;;  %s278_s0 = smov [#allocation6]  }
  0x12   :  { %s179_s1 = sshll.u32 %s278_s0, 4  ;;  %s180_s1 = int_to_ptr.vmem [resolvable:$true] %s179_s1 }
  0x13   :  { %v303_v3 = vsub.s32 %v51_v2, %v35_v1  ;;  %v36_v4 = vsub.s32 0, %v35_v1  ;;  %v74_v21 = vsub.s32 1, %v35_v1  ;;  %s228_s21 = scalar_lea.vmem %s180_s1, 32  ;;  %p233_p6 = scmp.lt.s32.totalorder %s180_s1, %s180_s1 }
  0x14   :  { %p229_p5 = scmp.ne.s32.totalorder %s180_s1, %s228_s21  ;;  %p234_p7 = scmp.lt.s32.totalorder %s228_s21, %s228_s21 }
  0x15   :  { %v37_v9 = vrot.slane %v32_v6, %v36_v4 }
  0x16   :  { %p235_p8 = por %p234_p7, %p233_p6 }
  0x17   :  { %v39_v10 = vmul.f32 %v37_v9, %v29_v7  ;;  %v40_v11 = vmul.f32 %v37_v9, %v30_v8 }
  0x18   :  { %p236_p9 = pnand %p235_p8, %p229_p5 }
  0x19   :  { %v42_v12 = vsel %vm41_vm0, %v39_v10, 0.0  ;;  %v45_v13 = vsel %vm41_vm0, %v40_v11, 0.0 }
  0x1a   :  { %43 = vadd.xlane.f32.xlu0 %v42_v12 }
  0x1e   :  { %46 = vadd.xlane.f32.xlu0 %v45_v13 }
  0xa3   :  { %v44_v14 = vpop.xlane.xlu0 %43 }
  0xa4   :  { %v55_v16 = vrot.slane %v44_v14, %v303_v3 }
  0xa7   :  { %v47_v15 = vpop.xlane.xlu0 %46 }
  0xa8   :  { %v59_v17 = vrot.slane %v47_v15, %v303_v3 }
  0xaa   :  { %v61_v18 = vsel %vm60_vm1, %v59_v17, %v55_v16 }
  0xab   :  { %v64_v19 = vsel %vm63_vm2, %v61_v18, -inf }
  0xac   :  { %65 = vmax.xlane.f32.xlu1 %v64_v19 }
 0x135   :  { %v66_v22 = vpop.xlane.xlu1 %65 }
 0x136   :  { %v71_v23 = vrot.slane %v66_v22, %v36_v4  ;;  %v75_v24 = vrot.slane %v66_v22, %v74_v21 }
 0x138   :  { %v78_v25 = vsub.f32 %v44_v14, %v71_v23  ;;  %v79_v26 = vsub.f32 %v47_v15, %v75_v24 }
 0x13a   :  { %v80_v27 = vmul.f32 1.442695, %v78_v25  ;;  %v82_v28 = vmul.f32 1.442695, %v79_v26 }
 0x13c   :  { %200 = vpow2.f32 %v80_v27 }
 0x13d   :  { %202 = vpow2.f32 %v82_v28 }
 0x149   :  { %v201_v29 = vpop.eup %200 }
 0x14a   :  { %v203_v30 = vpop.eup %202  ;;  %87 = vperm.xlu1 %198, %v201_v29  }
 0x14b   :  { %90 = vperm.xlu0 %199, %v203_v30  }
 0x1c5   :  { %v88_v31 = vpop.permute.xlu1 %87 }
 0x1c6   :  { %v91_v32 = vpop.permute.xlu0 %90  ;;  %v95_v33 = vrot.slane %v88_v31, %v303_v3 }
 0x1c7   :  { %v99_v34 = vrot.slane %v91_v32, %v303_v3 }
 0x1c9   :  { %v100_v35 = vsel %vm60_vm1, %v99_v34, %v95_v33 }
 0x1ca   :  { %v102_v36 = vsel %vm63_vm2, %v100_v35, 0.0 }
 0x1cb   :  { %103 = vadd.xlane.f32.xlu1 %v102_v36 }
 0x254   :  { %v104_v37 = vpop.xlane.xlu1 %103 }
 0x255   :  { %v109_v38 = vrot.slane %v104_v37, %v36_v4  ;;  %v113_v39 = vrot.slane %v104_v37, %v74_v21 }
 0x257   :  { %204 = vrcp.f32 %v109_v38 }
 0x258   :  { %206 = vrcp.f32 %v113_v39 }
 0x264   :  { %v205_v40 = vpop.eup %204 }
 0x265   :  { %v117_v41 = vmul.f32 %v205_v40, %v201_v29  ;;  %v207_v42 = vpop.eup %206 }
 0x266   :  { %v119_v43 = vmul.f32 %v207_v42, %v203_v30 }
 0x267   :  { %123 = vperm.xlu0 %199, %v117_v41  }
 0x26b   :  { %126 = vperm.xlu0 %199, %v119_v43  }
 0x2e2   :  { %v124_v44 = vpop.permute.xlu0 %123 }
 0x2e3   :  { %v141_v45 = vmul.f32 %v124_v44, %v29_v7  ;;  %v131_v49 = vrot.slane %v124_v44, %v303_v3 }
 0x2e5   :  { %v143_v46 = vsel %vm41_vm0, %v141_v45, 0.0 }
 0x2e6   :  { %v144_v47 = vrot.slane %v143_v46, 4  ;;  %v127_v48 = vpop.permute.xlu0 %126 }
 0x2e7   :  { %v135_v50 = vrot.slane %v127_v48, %v303_v3  ;;  %v142_v51 = vmul.f32 %v127_v48, %v30_v8 }
 0x2e8   :  { %v145_v52 = vadd.f32 %v144_v47, %v143_v46 }
 0x2e9   :  { %v150_v53 = vsel %vm41_vm0, %v142_v51, 0.0  ;;  %v136_v54 = vsel %vm60_vm1, %v135_v50, %v131_v49 }
 0x2ea   :  { %v146_v55 = vrot.slane %v145_v52, 2  ;;  %v151_v56 = vrot.slane %v150_v53, 4  ;;  %138 = vst.msk [vmem:[#allocation6] sm:$0x3] %vm63_vm2, %v136_v54 }
 0x2eb   :  { %239 = shalt.err (!%p236_p9)
}
 0x2ec   :  { %182 = dma.vmem_to_hbm [thread:$0]  %s180_s1, 32, %s334_s3, [#allocation7]   ;;  %v147_v57 = vadd.f32 %v146_v55, %v145_v52  ;;  %v152_v58 = vadd.f32 %v151_v56, %v150_v53  ;;  %vm161_vm3 = vcmask 254976  }
 0x2ed   :  { %s279_s24 = smov [#allocation5]  }
 0x2ee   :  { %v153_v59 = vrot.slane %v152_v58, 2  ;;  %v148_v60 = vrot.slane %v147_v57, 1  ;;  %s169_s25 = sshll.u32 %s279_s24, 4  ;;  %s170_s25 = int_to_ptr.vmem [resolvable:$true] %s169_s25 }
 0x2ef   :  { %s248_s26 = scalar_lea.vmem %s170_s25, 32  ;;  %p253_p11 = scmp.lt.s32.totalorder %s170_s25, %s170_s25 }
 0x2f0   :  { %v154_v61 = vadd.f32 %v153_v59, %v152_v58  ;;  %v149_v0 = vadd.f32 %v148_v60, %v147_v57  ;;  %p249_p10 = scmp.ne.s32.totalorder %s170_s25, %s248_s26  ;;  %p254_p12 = scmp.lt.s32.totalorder %s248_s26, %s248_s26 }
 0x2f2   :  { %v155_v62 = vrot.slane %v154_v61, 1  ;;  %p255_p13 = por %p254_p12, %p253_p11 }
 0x2f4   :  { %v156_v63 = vadd.f32 %v155_v62, %v154_v61  ;;  %p256_p0 = pnand %p255_p13, %p249_p10 }
 0x2f6   :  { %v159_v1 = vsel %vm60_vm1, %v156_v63, %v149_v0 }
 0x2f7   :  { %162 = vst.msk [vmem:[#allocation5] sm:$0x3] %vm161_vm3, %v159_v1 }
 0x2f8   :  { %259 = shalt.err (!%p256_p0)
}
 0x2f9   :  { %172 = dma.vmem_to_hbm [thread:$0]  %s170_s25, 32, %s333_s2, [#allocation4]  }
 0x2fa   :  { %270 = dma.done.wait [#allocation4], 32  }
 0x2fb   :  { %271 = vsyncadd [#allocation4], 4294967264 }
 0x2fc   :  { %272 = dma.done.wait [#allocation7], 32  }
 0x2fd   :  { %273 = vsyncadd [#allocation7], 4294967264 }
 0x2fe   :  { %189 = vsyncpa [#allocation3], 1 }
 0x2ff   :  { %190 = vsyncpa [#allocation4], 1 }
 0x300   :  { %191 = vsyncpa [#allocation7], 1 }

</bundles_post_ra>
